<compile_context>
chip_gen: v7x
topology: tpu7x:2x2x1
jax: 0.10.0
libtpu: 0.0.40
codegen_flags: <defaults>
</compile_context>

<pallas_src>
import functools

import jax
import jax.numpy as jnp
from jax import lax
from jax.experimental import pallas as pl
from jax.experimental.pallas import tpu as pltpu

EPS = 1e-5          # nn.BatchNorm2d default
NEG_SLOPE = 0.01    # nn.LeakyReLU default


# ---------------------------------------------------------------------------
# Pallas kernels (hot path): conv-as-matmul + bias (+ BN) (+ LeakyReLU)
# Transposed, lane-dense layout:
#   xcol : (9*Cin, M)    M = N*Ho*Wo  (lane axis)
#   w    : (Cout, 9*Cin)
#   out  : (Cout, M)
# ---------------------------------------------------------------------------
def _conv_act_kernel(xcol_ref, w_ref, b_ref, o_ref, *, apply_act):
    y = jnp.dot(w_ref[...], xcol_ref[...], preferred_element_type=jnp.float32)
    y = y + b_ref[...]                                   # (Cout, M) + (Cout, 1)
    if apply_act:
        y = jnp.where(y >= 0.0, y, NEG_SLOPE * y)
    o_ref[...] = y


def _conv_bn_act_kernel(xcol_ref, w_ref, b_ref, g_ref, beta_ref, o_ref):
    y = jnp.dot(w_ref[...], xcol_ref[...], preferred_element_type=jnp.float32)
    y = y + b_ref[...]
    # BatchNorm2d, training mode: batch stats over (N, H, W) == lane axis.
    mean = jnp.mean(y, axis=1, keepdims=True)            # (Cout, 1)
    var = jnp.mean((y - mean) * (y - mean), axis=1, keepdims=True)
    y = g_ref[...] * (y - mean) * lax.rsqrt(var + EPS) + beta_ref[...]
    o_ref[...] = jnp.where(y >= 0.0, y, NEG_SLOPE * y)   # LeakyReLU


# ---------------------------------------------------------------------------
# Glue: im2col (strided, padded) in the transposed layout + wcol reshape
# ---------------------------------------------------------------------------
def _im2col_t(x_nhwc, stride, pad):
    """x_nhwc (N,H,W,C) -> (9*C, N*Ho*Wo), rows indexed (ky*3+kx)*C + ci."""
    N, H, W, C = x_nhwc.shape
    Ho = (H + 2 * pad - 3) // stride + 1
    Wo = (W + 2 * pad - 3) // stride + 1
    xp = jnp.pad(x_nhwc, ((0, 0), (pad, pad), (pad, pad), (0, 0)))
    taps = []
    for ky in range(3):
        for kx in range(3):
            taps.append(lax.slice(
                xp,
                (0, ky, kx, 0),
                (N, ky + stride * (Ho - 1) + 1, kx + stride * (Wo - 1) + 1, C),
                (1, stride, stride, 1)))
    cols = jnp.concatenate(taps, axis=-1)                 # (N, Ho, Wo, 9*C)
    return cols.reshape(N * Ho * Wo, 9 * C).T, Ho, Wo     # (9*C, M)


def _wcol(w_oihw):
    """(Cout, Cin, 3, 3) -> (Cout, 9*Cin), cols indexed (ky*3+kx)*Cin + ci."""
    cout, cin = w_oihw.shape[0], w_oihw.shape[1]
    return jnp.transpose(w_oihw, (0, 2, 3, 1)).reshape(cout, 9 * cin)


def _full_spec(shape):
    return pl.BlockSpec(shape, lambda i: (0,) * len(shape))


def _conv_layer(xcol, wcol, b, gamma, beta, apply_act):
    k9, m = xcol.shape
    cout = wcol.shape[0]
    col = lambda v: v.reshape(cout, 1).astype(jnp.float32)

    if gamma is None:
        kernel = functools.partial(_conv_act_kernel, apply_act=apply_act)
        args = (xcol, wcol, col(b))
    else:
        kernel = _conv_bn_act_kernel
        args = (xcol, wcol, col(b), col(gamma), col(beta))

    return pl.pallas_call(
        kernel,
        out_shape=jax.ShapeDtypeStruct((cout, m), jnp.float32),
        grid=(1,),
        in_specs=[_full_spec(a.shape) for a in args],
        out_specs=_full_spec((cout, m)),
        compiler_params=pltpu.CompilerParams(dimension_semantics=("arbitrary",)),
    )(*args)


# ---------------------------------------------------------------------------
# Forward pass over the whole Discriminator
# ---------------------------------------------------------------------------
def discriminator_forward(x_nchw, layers):
    N = x_nchw.shape[0]
    x_nhwc = jnp.transpose(x_nchw, (0, 2, 3, 1)).astype(jnp.float32)
    for layer in layers:
        w = layer["w"].astype(jnp.float32)
        xcol, ho, wo = _im2col_t(x_nhwc, layer["stride"], layer["padding"])
        y = _conv_layer(xcol, _wcol(w), layer["b"],
                        layer["gamma"], layer["beta"], layer["act"])
        x_nhwc = y.T.reshape(N, ho, wo, w.shape[0])       # back to NHWC (glue)
    return jnp.transpose(x_nhwc, (0, 3, 1, 2))            # NCHW


# ---------------------------------------------------------------------------
# Pure-JAX reference (correctness check)
# ---------------------------------------------------------------------------
def discriminator_reference(x_nchw, layers):
    h = x_nchw.astype(jnp.float32)
    for layer in layers:
        s, p = layer["stride"], layer["padding"]
        h = lax.conv_general_dilated(
            h, layer["w"].astype(jnp.float32), (s, s), [(p, p), (p, p)],
            dimension_numbers=("NCHW", "OIHW", "NCHW"))
        h = h + layer["b"][None, :, None, None]
        if layer["gamma"] is not None:
            mean = jnp.mean(h, axis=(0, 2, 3), keepdims=True)
            var = jnp.mean((h - mean) ** 2, axis=(0, 2, 3), keepdims=True)
            h = (layer["gamma"][None, :, None, None] * (h - mean)
                 * lax.rsqrt(var + EPS) + layer["beta"][None, :, None, None])
        if layer["act"]:
            h = jnp.where(h >= 0.0, h, NEG_SLOPE * h)
        # TODO(synk): BatchNorm2d running-stat buffer updates are not modeled.
    return h


# ---------------------------------------------------------------------------
if __name__ == "__main__":
    N, in_fc, F, H, W = 2, 4, 4, 16, 16   # Discriminator(in_fc=4, filter_num=4)

    # (cin, cout, stride, padding, use_bn, use_act) — n_layers=3 expansion
    configs = [
        (in_fc, F,     2, 1, False, True),
        (F,     2 * F, 2, 2, True,  True),
        (2 * F, 4 * F, 2, 2, True,  True),
        (4 * F, 8 * F, 2, 2, True,  True),
        (8 * F, 1,     1, 1, False, False),
    ]

    key = jax.random.PRNGKey(0)
    layers = []
    for (cin, cout, s, p, use_bn, use_act) in configs:
        key, k1, k2, k3, k4 = jax.random.split(key, 5)
        wstd = (2.0 / (9 * cin)) ** 0.5
        layer = {
            "w": wstd * jax.random.normal(k1, (cout, cin, 3, 3), jnp.float32),
            "b": 0.05 * jax.random.normal(k2, (cout,), jnp.float32),
            "gamma": (1.0 + 0.1 * jax.random.normal(k3, (cout,), jnp.float32))
                     if use_bn else None,
            "beta": 0.1 * jax.random.normal(k4, (cout,), jnp.float32)
                    if use_bn else None,
            "stride": s, "padding": p, "act": use_act,
        }
        layers.append(layer)

    key, kx = jax.random.split(key)
    x = jax.random.normal(kx, (N, in_fc, H, W), jnp.float32)

    out = jax.block_until_ready(discriminator_forward(x, layers))
    ref = jax.block_until_ready(discriminator_reference(x, layers))

    assert out.shape == ref.shape == (N, 1, 3, 3), (out.shape, ref.shape)
    assert out.dtype == jnp.float32
    assert jnp.allclose(out, ref, atol=2e-3, rtol=2e-3), \
        f"max abs diff = {jnp.max(jnp.abs(out - ref))}"

    print("KERNEL_OK")
</pallas_src>

<mosaic_0001>
module attributes {stable_mosaic.version = 11 : i64} {
  func.func @_conv_act_kernel(%arg0: i32, %arg1: memref<36x128xf32, #tpu.memory_space<vmem>>, %arg2: memref<4x36xf32, #tpu.memory_space<vmem>>, %arg3: memref<4x1xf32, #tpu.memory_space<vmem>>, %arg4: memref<4x128xf32, #tpu.memory_space<vmem>>) attributes {dimension_semantics = [#tpu.dimension_semantics<arbitrary>], iteration_bounds = array<i64: 1>, scalar_prefetch = 0 : i64, scratch_operands = 0 : i64, tpu.core_type = #tpu.core_type<tc>, window_params = [{pipeline_mode = #tpu.pipeline_mode<synchronous>, transform_indices = @transform_0, window_bounds = array<i64: 36, 128>}, {pipeline_mode = #tpu.pipeline_mode<synchronous>, transform_indices = @transform_1, window_bounds = array<i64: 4, 36>}, {pipeline_mode = #tpu.pipeline_mode<synchronous>, transform_indices = @transform_2, window_bounds = array<i64: 4, 1>}, {pipeline_mode = #tpu.pipeline_mode<synchronous>, transform_indices = @transform_3, window_bounds = array<i64: 4, 128>}]} {
    %c0 = arith.constant 0 : index
    %c0_0 = arith.constant 0 : index
    %0 = vector.load %arg2[%c0, %c0_0] : memref<4x36xf32, #tpu.memory_space<vmem>>, vector<4x36xf32>
    %c0_1 = arith.constant 0 : index
    %c0_2 = arith.constant 0 : index
    %1 = vector.load %arg1[%c0_1, %c0_2] : memref<36x128xf32, #tpu.memory_space<vmem>>, vector<36x128xf32>
    %cst = arith.constant dense<0.000000e+00> : vector<4x128xf32>
    %2 = tpu.matmul %0, %1, %cst {dimension_numbers = #tpu.dot_dimension_numbers<[1], [0], [0], [1], [0, 0, 1, 1], [], []>} : vector<4x36xf32>, vector<36x128xf32>, vector<4x128xf32> -> vector<4x128xf32>
    %c0_3 = arith.constant 0 : index
    %c0_4 = arith.constant 0 : index
    %3 = vector.load %arg3[%c0_3, %c0_4] : memref<4x1xf32, #tpu.memory_space<vmem>>, vector<4x1xf32>
    %4 = vector.broadcast %3 : vector<4x1xf32> to vector<4x128xf32>
    %5 = arith.addf %2, %4 : vector<4x128xf32>
    %cst_5 = arith.constant 0.000000e+00 : f32
    %6 = vector.broadcast %cst_5 : f32 to vector<4x128xf32>
    %7 = arith.cmpf oge, %5, %6 : vector<4x128xf32>
    %cst_6 = arith.constant 0.00999999977 : f32
    %8 = vector.broadcast %cst_6 : f32 to vector<4x128xf32>
    %9 = arith.mulf %8, %5 : vector<4x128xf32>
    %10 = arith.select %7, %5, %9 : vector<4x128xi1>, vector<4x128xf32>
    %c0_7 = arith.constant 0 : index
    %c0_8 = arith.constant 0 : index
    %11 = vector.load %arg4[%c0_7, %c0_8] : memref<4x128xf32, #tpu.memory_space<vmem>>, vector<4x128xf32>
    tpu.vector_store %arg4[%c0_7, %c0_8], %10 {strides = array<i32>} : memref<4x128xf32, #tpu.memory_space<vmem>>, vector<4x128xf32>,
    return
  }
  func.func @transform_0(%arg0: i32) -> (i32, i32) {
    %c0_i32 = arith.constant 0 : i32
    %c0_i32_0 = arith.constant 0 : i32
    %c0_i32_1 = arith.constant 0 : i32
    return %c0_i32, %c0_i32_0 : i32, i32
  }
  func.func @transform_1(%arg0: i32) -> (i32, i32) {
    %c0_i32 = arith.constant 0 : i32
    %c0_i32_0 = arith.constant 0 : i32
    %c0_i32_1 = arith.constant 0 : i32
    return %c0_i32, %c0_i32_0 : i32, i32
  }
  func.func @transform_2(%arg0: i32) -> (i32, i32) {
    %c0_i32 = arith.constant 0 : i32
    %c0_i32_0 = arith.constant 0 : i32
    %c0_i32_1 = arith.constant 0 : i32
    return %c0_i32, %c0_i32_0 : i32, i32
  }
  func.func @transform_3(%arg0: i32) -> (i32, i32) {
    %c0_i32 = arith.constant 0 : i32
    %c0_i32_0 = arith.constant 0 : i32
    %c0_i32_1 = arith.constant 0 : i32
    return %c0_i32, %c0_i32_0 : i32, i32
  }
}

</mosaic_0001>

<bundles_post_ra>
// kernel: tpu_custom_call.1
= control target key start
LH: loop header
LB: loop body
LE: loop exit
PB: predicated region body
PF: predicated region fallthrough
CT: control target
= control target key end

     0   :  { %8 = vsyncpa [#allocation3], 0  ;;  %s280_s0 = inlined_call_operand.hbm [shape: f32[36,128], index: 0, kind: input, shape index: {}]   ;;  %s281_s1 = inlined_call_operand.vmem [shape: f32[4,36], index: 1, kind: input, shape index: {}]   ;;  %s282_s2 = inlined_call_operand.vmem [shape: f32[4,1], index: 2, kind: input, shape index: {}]   ;;  %s283_s3 = inlined_call_operand.hbm [shape: f32[4,128], index: 3, kind: output, shape index: {}]  }
   0x1   :  { %9 = vsyncpa [#allocation4], 0  ;;  %s222_s12 = smov [#allocation2]   ;;  %s174_s16 = scalar_lea.hbm %s280_s0, 640 }
   0x2   :  { %s15_s13 = sshll.u32 %s222_s12, 4  ;;  %p175_p0 = scmp.ne.s32.totalorder %s280_s0, %s174_s16  ;;  %s16_s13 = int_to_ptr.vmem [resolvable:$true] %s15_s13 }
   0x3   :  { %p178_p1 = scmp.lt.u32.totalorder %s174_s16, %s280_s0 }
   0x5   :  { %p180_p2 = pnand %p178_p1, %p175_p0 }
   0x7   :  { %183 = shalt.err (!%p180_p2)
}
   0x8   :  { %s184_s21 = scalar_lea.vmem %s16_s13, 640  ;;  %p189_p4 = scmp.lt.s32.totalorder %s16_s13, %s16_s13 }
   0x9   :  { %p185_p3 = scmp.ne.s32.totalorder %s16_s13, %s184_s21  ;;  %p190_p5 = scmp.lt.s32.totalorder %s184_s21, %s184_s21 }
   0xb   :  { %p191_p6 = por %p190_p5, %p189_p4 }
   0xd   :  { %p192_p7 = pnand %p191_p6, %p185_p3 }
   0xf   :  { %195 = shalt.err (!%p192_p7)
}
  0x10   :  { %s223_s22 = smov 128   ;;  %s224_s23 = smov 8  }
  0x11   :  { %21 = dma.hbm_to_vmem [thread:$0]  %s280_s0, 640, %s16_s13, [#allocation3], %s223_s22, %s223_s22, %s224_s23  }
  0x12   :  { %218 = dma.done.wait [#allocation3], 640  }
  0x13   :  { %219 = vsyncadd [#allocation3], 4294966656  ;;  %v225_v0 = vmov 0.0|0.0   ;;  %vm226_vm0 = vmmov 0   ;;  %v227_v1 = vmov 0.0   ;;  %v228_v2 = vmov 0  }
  0x14   :  { %159 = vmatprep.subr.bf16.mxu0 %v225_v0  ;;  %156 = vmatprep.mubr.msk.f32.mxu0 %vm226_vm0, %v227_v1  ;;  %v30_v3 = vld [vmem:[#allocation2] sm:$0xff]  ;;  %v31_v4 = vld [vmem:[#allocation2 + $0x8] sm:$0xff]  ;;  %v32_v5 = vld [vmem:[#allocation2 + $0x10] sm:$0xff]  ;;  %vm45_vm1 = vcmask 1043456   ;;  %vm41_vm2 = vcmask 293888  }
  0x15   :  { %173 = vset.pattern.permute.xlu0 %v228_v2  ;;  %v160_v6 = vpack.c.bf16 %v31_v4, %v30_v3  ;;  %v33_v7 = vld [vmem:[#allocation2 + $0x18] sm:$0xff]  ;;  %v35_v8 = vld [vmem:[%s282_s2] sm:$0xf]  ;;  %s229_s2 = smov [#allocation5]  }
  0x16   :  { %v163_v9 = vpack.c.bf16 %v33_v7, %v32_v5  ;;  %38 = vperm.xlu0 %173, %v35_v8   ;;  %v34_v10 = vld [vmem:[#allocation2 + $0x20] sm:$0xf]  ;;  %s129_s29 = sshll.u32 %s229_s2, 4  ;;  %s130_s29 = int_to_ptr.vmem [resolvable:$true] %s129_s29 }
  0x17   :  { %161 = vmatpush3.bf16.msra.mxu0 %v160_v6  ;;  %v29_v11 = vld [vmem:[%s281_s1] sm:$0xf]  ;;  %s196_s30 = scalar_lea.vmem %s130_s29, 64  ;;  %p201_p9 = scmp.lt.s32.totalorder %s130_s29, %s130_s29 }
  0x18   :  { %162 = vmatprep.subr.bf16.mxu0 %v225_v0  ;;  %p197_p8 = scmp.ne.s32.totalorder %s130_s29, %s196_s30  ;;  %p202_p10 = scmp.lt.s32.totalorder %s196_s30, %s196_s30 }
  0x1a   :  { %p203_p11 = por %p202_p10, %p201_p9 }
  0x1b   :  { %164 = vmatpush3.bf16.msra.mxu0 %v163_v9 }
  0x1c   :  { %154 = vmatprep.subr.mxu0 %v227_v1  ;;  %p204_p12 = pnand %p203_p11, %p197_p8 }
  0x1f   :  { %155 = vmatpush3.msk.msra.mxu0 %vm45_vm1, %v34_v10 }
  0x20   :  { %157 = vmatmul.mubr.msk.f32.vlgmr.msra.gmra.mrb[0].mxu0 %vm41_vm2, %v29_v11 }
  0x95   :  { %v39_v12 = vpop.permute.xlu0 %38 }
  0xf3   :  { %v115_v13 = vpop.f32.mrb[0].mxu0 }
  0xf4   :  { %v116_v14 = vadd.f32 %v115_v13, %v39_v12  ;;  %v158_v15 = vpop.f32.mrb[1].mxu0 }
  0xf6   :  { %v120_v16 = vmul.f32 0.01, %v116_v14  ;;  %vm119_vm3 = vcmp.ge.f32.partialorder %v116_v14, 0.0 }
  0xf8   :  { %v121_v17 = vsel %vm119_vm3, %v116_v14, %v120_v16 }
  0xf9   :  { %122 = vst [vmem:[#allocation5] sm:$0xf] %v121_v17 }
  0xfa   :  { %207 = shalt.err (!%p204_p12)
}
  0xfb   :  { %s208_s5 = scalar_lea.hbm %s283_s3, 64 }
  0xfc   :  { %p209_p13 = scmp.ne.s32.totalorder %s283_s3, %s208_s5  ;;  %p212_p0 = scmp.lt.u32.totalorder %s208_s5, %s283_s3 }
  0xfe   :  { %p214_p1 = pnand %p212_p0, %p209_p13 }
 0x100   :  { %217 = shalt.err (!%p214_p1)
}
 0x101   :  { %132 = dma.vmem_to_hbm [thread:$0]  %s130_s29, 64, %s283_s3, [#allocation4]  }
 0x102   :  { %220 = dma.done.wait [#allocation4], 64  }
 0x103   :  { %221 = vsyncadd [#allocation4], 4294967232 }
 0x104   :  { %136 = vsyncpa [#allocation3], 1 }
 0x105   :  { %137 = vsyncpa [#allocation4], 1 }

</bundles_post_ra>
